<compile_context>
chip_gen: v6e
topology: v6e:2x2x1
jax: 0.10.0
libtpu: 0.0.40
codegen_flags: <defaults>
</compile_context>

<pallas_src>
import jax
import jax.numpy as jnp
from jax.experimental import pallas as pl
from jax.experimental.pallas import tpu as pltpu

HIDDEN_DIM = 32          # config.hidden_dim
NORM_INIT_STD = 1e-4     # config.norm_init_std


def _reduce_state_kernel(h_ref, c_ref, w_ref, b_ref, o_ref):
    # h_ref, c_ref : (2, B, H) f32   bidirectional last states
    # w_ref        : (4H, 2H) bf16   block-diagonal [[W_h^T, 0], [0, W_c^T]]
    # b_ref        : (1, 2H)  f32    [b_h | b_c]
    # o_ref        : (B, 2H)  f32    [relu(h_in@W_h^T+b_h) | relu(c_in@W_c^T+b_c)]
    #
    # transpose(0,1).reshape(B, 2H) of each state is exactly the lane-concat of
    # its two direction slices; stacking the h and c paths along lanes gives a
    # single K=4H=128 contraction with a lane-dense N=2H=64 output.
    x = jnp.concatenate(
        [h_ref[0], h_ref[1], c_ref[0], c_ref[1]], axis=-1)        # (B, 4H) f32
    y = jnp.dot(x.astype(jnp.bfloat16), w_ref[...],
                preferred_element_type=jnp.float32)               # (B, 2H) f32
    y = y + b_ref[...]                                            # bias broadcast
    o_ref[...] = jnp.maximum(y, 0.0).astype(o_ref.dtype)


def reduce_state_fwd(h, c, w_block, b_cat):
    """Fused forward. Returns (relu(h_in @ W_h^T + b_h), relu(c_in @ W_c^T + b_c))."""
    n_dir, B, H = h.shape
    assert n_dir == 2

    flops = 2 * B * (4 * H) * (2 * H)                 # one (B,4H)@(4H,2H) GEMM
    bytes_accessed = (h.size * 4 + c.size * 4
                      + w_block.size * jnp.dtype(w_block.dtype).itemsize
                      + b_cat.size * 4
                      + B * 2 * H * 4)

    out = pl.pallas_call(
        _reduce_state_kernel,
        out_shape=jax.ShapeDtypeStruct((B, 2 * H), jnp.float32),
        in_specs=[
            pl.BlockSpec(memory_space=pltpu.MemorySpace.VMEM),    # h
            pl.BlockSpec(memory_space=pltpu.MemorySpace.VMEM),    # c
            pl.BlockSpec(memory_space=pltpu.MemorySpace.VMEM),    # block-diag W
            pl.BlockSpec(memory_space=pltpu.MemorySpace.VMEM),    # bias
        ],
        out_specs=pl.BlockSpec(memory_space=pltpu.MemorySpace.VMEM),
        cost_estimate=pl.CostEstimate(flops=flops, transcendentals=0,
                                      bytes_accessed=bytes_accessed),
    )(h, c, w_block, b_cat)

    return out[:, :H], out[:, H:]                     # free slices in XLA


class ReduceStatePallas:
    """Deterministically-initialized equivalent of the PyTorch ReduceState."""

    def __init__(self, key, hidden_dim=HIDDEN_DIM):
        self.hidden_dim = hidden_dim
        H = hidden_dim
        k1, k2 = jax.random.split(key, 2)
        # PyTorch init: reduce_h.weight ~ N(0, norm_init_std),
        #               reduce_c.weight ~ N(0, 1), biases zero.
        # Stored transposed (2H, H), bf16 (single-pass MXU operand).
        self.w_h_t = (jax.random.normal(k1, (2 * H, H), jnp.float32)
                      * NORM_INIT_STD).astype(jnp.bfloat16)
        self.w_c_t = jax.random.normal(k2, (2 * H, H),
                                       jnp.float32).astype(jnp.bfloat16)
        self.b_h = jnp.zeros((H,), jnp.float32)
        self.b_c = jnp.zeros((H,), jnp.float32)

        # Block-diagonal RHS so both paths become one (B,4H)@(4H,2H) matmul.
        w_block = jnp.zeros((4 * H, 2 * H), jnp.bfloat16)
        w_block = w_block.at[:2 * H, :H].set(self.w_h_t)
        w_block = w_block.at[2 * H:, H:].set(self.w_c_t)
        self.w_block = w_block
        self.b_cat = jnp.concatenate([self.b_h, self.b_c]).reshape(1, 2 * H)

    def __call__(self, hidden):
        h, c = hidden                                   # each (2, B, H)
        out_h, out_c = reduce_state_fwd(h, c, self.w_block, self.b_cat)
        return out_h[None, :, :], out_c[None, :, :]     # (1, B, H) each


if __name__ == "__main__":
    batch = 4
    key = jax.random.PRNGKey(0)
    k_h, k_c, k_p = jax.random.split(key, 3)

    h = jax.random.normal(k_h, (2, batch, HIDDEN_DIM), jnp.float32)
    c = jax.random.normal(k_c, (2, batch, HIDDEN_DIM), jnp.float32)

    module = ReduceStatePallas(k_p)
    out_h, out_c = jax.block_until_ready(module((h, c)))

    # Reference: pure JAX, same bf16 operands, f32 accumulation.
    def ref(x, w_t, b):
        B = x.shape[1]
        xi = jnp.transpose(x, (1, 0, 2)).reshape(B, 2 * HIDDEN_DIM)
        y = jnp.dot(xi.astype(jnp.bfloat16), w_t,
                    preferred_element_type=jnp.float32) + b
        return jnp.maximum(y, 0.0)[None]

    assert out_h.shape == (1, batch, HIDDEN_DIM)
    assert out_c.shape == (1, batch, HIDDEN_DIM)
    assert jnp.allclose(out_h, ref(h, module.w_h_t, module.b_h),
                        rtol=1e-3, atol=1e-5)
    assert jnp.allclose(out_c, ref(c, module.w_c_t, module.b_c),
                        rtol=1e-3, atol=1e-5)

    print("KERNEL_OK")
</pallas_src>

<mosaic_0001>
module attributes {stable_mosaic.version = 11 : i64} {
  func.func @_reduce_state_kernel(%arg0: memref<2x4x32xf32, #tpu.memory_space<vmem>>, %arg1: memref<2x4x32xf32, #tpu.memory_space<vmem>>, %arg2: memref<128x64xbf16, #tpu.memory_space<vmem>>, %arg3: memref<1x64xf32, #tpu.memory_space<vmem>>, %arg4: memref<4x64xf32, #tpu.memory_space<vmem>>) attributes {dimension_semantics = [], scalar_prefetch = 0 : i64, scratch_operands = 0 : i64, tpu.core_type = #tpu.core_type<tc>} {
    %c0 = arith.constant 0 : index
    %c0_0 = arith.constant 0 : index
    %c0_1 = arith.constant 0 : index
    %0 = vector.load %arg0[%c0, %c0_0, %c0_1] : memref<2x4x32xf32, #tpu.memory_space<vmem>>, vector<1x4x32xf32>
    %1 = vector.shape_cast %0 : vector<1x4x32xf32> to vector<4x32xf32>
    %c1 = arith.constant 1 : index
    %c0_2 = arith.constant 0 : index
    %c0_3 = arith.constant 0 : index
    %2 = vector.load %arg0[%c1, %c0_2, %c0_3] : memref<2x4x32xf32, #tpu.memory_space<vmem>>, vector<1x4x32xf32>
    %3 = vector.shape_cast %2 : vector<1x4x32xf32> to vector<4x32xf32>
    %c0_4 = arith.constant 0 : index
    %c0_5 = arith.constant 0 : index
    %c0_6 = arith.constant 0 : index
    %4 = vector.load %arg1[%c0_4, %c0_5, %c0_6] : memref<2x4x32xf32, #tpu.memory_space<vmem>>, vector<1x4x32xf32>
    %5 = vector.shape_cast %4 : vector<1x4x32xf32> to vector<4x32xf32>
    %c1_7 = arith.constant 1 : index
    %c0_8 = arith.constant 0 : index
    %c0_9 = arith.constant 0 : index
    %6 = vector.load %arg1[%c1_7, %c0_8, %c0_9] : memref<2x4x32xf32, #tpu.memory_space<vmem>>, vector<1x4x32xf32>
    %7 = vector.shape_cast %6 : vector<1x4x32xf32> to vector<4x32xf32>
    %8 = tpu.concatenate %1, %3, %5, %7 in 1 : vector<4x32xf32>, vector<4x32xf32>, vector<4x32xf32>, vector<4x32xf32> -> vector<4x128xf32>
    %9 = arith.truncf %8 : vector<4x128xf32> to vector<4x128xbf16>
    %c0_10 = arith.constant 0 : index
    %c0_11 = arith.constant 0 : index
    %10 = vector.load %arg2[%c0_10, %c0_11] : memref<128x64xbf16, #tpu.memory_space<vmem>>, vector<128x64xbf16>
    %cst = arith.constant dense<0.000000e+00> : vector<4x64xf32>
    %11 = tpu.matmul %9, %10, %cst {dimension_numbers = #tpu.dot_dimension_numbers<[1], [0], [0], [1], [0, 0, 1, 1], [], []>} : vector<4x128xbf16>, vector<128x64xbf16>, vector<4x64xf32> -> vector<4x64xf32>
    %c0_12 = arith.constant 0 : index
    %c0_13 = arith.constant 0 : index
    %12 = vector.load %arg3[%c0_12, %c0_13] : memref<1x64xf32, #tpu.memory_space<vmem>>, vector<1x64xf32>
    %13 = vector.broadcast %12 : vector<1x64xf32> to vector<4x64xf32>
    %14 = arith.addf %11, %13 : vector<4x64xf32>
    %cst_14 = arith.constant 0.000000e+00 : f32
    %15 = vector.broadcast %cst_14 : f32 to vector<4x64xf32>
    %16 = arith.maximumf %14, %15 : vector<4x64xf32>
    %c0_15 = arith.constant 0 : index
    %c0_16 = arith.constant 0 : index
    %17 = vector.load %arg4[%c0_15, %c0_16] : memref<4x64xf32, #tpu.memory_space<vmem>>, vector<4x64xf32>
    tpu.vector_store %arg4[%c0_15, %c0_16], %16 {strides = array<i32>} : memref<4x64xf32, #tpu.memory_space<vmem>>, vector<4x64xf32>,
    return
  }
}

</mosaic_0001>

<bundles_post_ra>
// kernel: tpu_custom_call.1
= control target key start
LH: loop header
LB: loop body
LE: loop exit
PB: predicated region body
PF: predicated region fallthrough
CT: control target
= control target key end

     0   :  { %s248_s19 = smov 32   ;;  %s249_s22 = smov 96   ;;  %v250_v3 = vmov 0.0   ;;  %vm252_vm0 = vmmov 0   ;;  %s321_s0 = inlined_call_operand.vmem [shape: f32[2,4,32], index: 0, kind: input, shape index: {}]   ;;  %s322_s1 = inlined_call_operand.vmem [shape: f32[2,4,32], index: 1, kind: input, shape index: {}]   ;;  %s323_s2 = inlined_call_operand.vmem [shape: bf16[128,64], index: 2, kind: input, shape index: {}]   ;;  %s324_s3 = inlined_call_operand.vmem [shape: f32[1,64], index: 3, kind: input, shape index: {}]   ;;  %s325_s4 = inlined_call_operand.hbm [shape: f32[4,64], index: 4, kind: output, shape index: {}]  }
   0x1   :  { %v172_v0 = vld [vmem:[%s321_s0 + $0x4] sm:$0xf]  ;;  %v22_v1 = vld [vmem:[%s322_s1] sm:$0xf]  ;;  %192 = vmatprep.subr.bf16.mxu0 %v250_v3  ;;  %v218_v4 = vld [vmem:[%s323_s2 + $0x38] sm:$0xff]   ;;  %s251_s27 = smov 64   ;;  %208 = vmatprep.mubr.msk.bf16.mxu0 %vm252_vm0, %v250_v3 }
   0x2   :  { %26 = vrot.lane.b32.xlu0 %v172_v0, %s248_s19  ;;  %v173_v2 = vld [vmem:[%s322_s1 + $0x4] sm:$0xf]  ;;  %193 = vmatpush3.bf16.msra.mxu0 %v218_v4  ;;  %v219_v5 = vld [vmem:[%s323_s2 + $0x30] sm:$0xff]   ;;  %v220_v6 = vld [vmem:[%s323_s2 + $0x28] sm:$0xff]  }
   0x3   :  { %34 = vrot.lane.b32.xlu1 %v173_v2, %s249_s22  ;;  %194 = vmatprep.subr.bf16.mxu0 %v250_v3 }
   0x6   :  { %30 = vrot.lane.b32.xlu0 %v22_v1, %s251_s27  ;;  %195 = vmatpush3.bf16.msra.mxu0 %v219_v5 }
   0x7   :  { %196 = vmatprep.subr.bf16.mxu0 %v250_v3 }
   0x8   :  { %9 = vsyncpa [#allocation3], 0  ;;  %v221_v7 = vld [vmem:[%s323_s2 + $0x20] sm:$0xff]   ;;  %v222_v8 = vld [vmem:[%s323_s2 + $0x18] sm:$0xff]   ;;  %vm37_vm1 = vcmask 261120   ;;  %vm39_vm2 = vcmask 523264  }
   0x9   :  { %v223_v9 = vld [vmem:[%s323_s2 + $0x10] sm:$0xff]   ;;  %v224_v10 = vld [vmem:[%s323_s2 + $0x8] sm:$0xff]   ;;  %v225_v11 = vld [vmem:[%s323_s2] sm:$0xff]   ;;  %vm41_vm3 = vcmask 785408   ;;  %s253_s2 = smov [#allocation2]   ;;  %vm156_vm4 = vcmask 519168  }
   0xa   :  { %197 = vmatpush3.bf16.msra.mxu0 %v220_v6  ;;  %v19_v13 = vld [vmem:[%s321_s0] sm:$0xf]  ;;  %s164_s17 = sshll.u32 %s253_s2, 4  ;;  %s165_s17 = int_to_ptr.vmem [resolvable:$true] %s164_s17 }
   0xb   :  { %198 = vmatprep.subr.bf16.mxu0 %v250_v3  ;;  %v174_v20 = vld [vmem:[%s324_s3] ss:$0 sm:$0xff]  ;;  %s226_s0 = scalar_lea.vmem %s165_s17, 64  ;;  %p231_p1 = scmp.lt.s32.totalorder %s165_s17, %s165_s17 }
   0xc   :  { %p227_p0 = scmp.ne.s32.totalorder %s165_s17, %s226_s0  ;;  %p232_p2 = scmp.lt.s32.totalorder %s226_s0, %s226_s0 }
   0xe   :  { %199 = vmatpush3.bf16.msra.mxu0 %v221_v7  ;;  %p233_p3 = por %p232_p2, %p231_p1 }
   0xf   :  { %200 = vmatprep.subr.bf16.mxu0 %v250_v3 }
  0x10   :  { %p234_p4 = pnand %p233_p3, %p227_p0 }
  0x12   :  { %201 = vmatpush3.bf16.msra.mxu0 %v222_v8 }
  0x13   :  { %202 = vmatprep.subr.bf16.mxu0 %v250_v3 }
  0x16   :  { %203 = vmatpush3.bf16.msra.mxu0 %v223_v9 }
  0x17   :  { %204 = vmatprep.subr.bf16.mxu0 %v250_v3 }
  0x1a   :  { %205 = vmatpush3.bf16.msra.mxu0 %v224_v10 }
  0x1b   :  { %206 = vmatprep.subr.bf16.mxu0 %v250_v3 }
  0x1e   :  { %207 = vmatpush3.bf16.msra.mxu0 %v225_v11 }
  0x74   :  { %v27_v12 = vpop.permute.xlu0 %26 }
  0x75   :  { %v35_v14 = vpop.permute.xlu1 %34  ;;  %v38_v15 = vsel %vm37_vm1, %v19_v13, %v27_v12 }
  0x78   :  { %v31_v16 = vpop.permute.xlu0 %30 }
  0x79   :  { %v40_v17 = vsel %vm39_vm2, %v38_v15, %v31_v16 }
  0x7a   :  { %v42_v18 = vsel %vm41_vm3, %v40_v17, %v35_v14 }
  0x7b   :  { %v43_v19 = vpack.c.bf16 %v42_v18, %v42_v18 }
  0x7d   :  { %209 = vmatmul.mubr.bf16.vlgmr.msra.gmra.mxu0 %v43_v19 }
 0x13d   :  { %v149_v21 = vpop.f32.mrf.mxu0 }
 0x13e   :  { %v150_v22 = vadd.f32 %v174_v20, %v149_v21 }
 0x13f   :  { %v210_v23 = vpop.f32.mrf.mxu0 }
 0x140   :  { %v155_v24 = vmax.f32 %v150_v22, 0.0 }
 0x141   :  { %v152_v25 = vpop.f32.mrf.mxu0 }
 0x142   :  { %157 = vst.msk [vmem:[#allocation2] sm:$0xf] %vm156_vm4, %v155_v24 }
 0x143   :  { %v211_v26 = vpop.f32.mrf.mxu0 }
 0x144   :  { %237 = shalt.err (!%p234_p4)
}
 0x145   :  { %167 = dma.vmem_to_hbm [thread:$0]  %s165_s17, 64, %s325_s4, [#allocation3]  }
 0x146   :  { %246 = dma.done.wait [#allocation3], 64  }
 0x147   :  { %247 = vsyncadd [#allocation3], 4294967232 }
 0x148   :  { %171 = vsyncpa [#allocation3], 1 }

</bundles_post_ra>
